<compile_context>
chip_gen: v7x
topology: tpu7x:2x2x1
jax: 0.10.0
libtpu: 0.0.40
codegen_flags: <defaults>
</compile_context>

<pallas_src>
import functools

import jax
import jax.numpy as jnp
from jax.experimental import pallas as pl
from jax.experimental.pallas import tpu as pltpu


def weighted_embedding_kernel(ids_ref, emb_ref, x_ref, o_ref, *,
                              groups: int, num_participants: int):
    """ids_ref: (TR, G) int32; emb_ref: (G*P, G*E); x_ref/o_ref: (TR, G*E)."""
    tr = x_ref.shape[0]
    gp = emb_ref.shape[0]                      # G * P  (one-hot width)

    ids = ids_ref[...]                         # (TR, G) int32, one load
    col = jax.lax.broadcasted_iota(jnp.int32, (tr, gp), 1)

    # Build the (TR, G*P) one-hot: column q*P + ids[r, q] is set for each group q.
    onehot = None
    for q in range(groups):                    # groups is tiny (<= 4): static unroll is fine
        m = col == (ids[:, q:q + 1] + q * num_participants)
        onehot = m if onehot is None else (onehot | m)

    # Gather all G*TR embedding rows in the packed layout with one MXU matmul.
    w = jnp.dot(onehot.astype(emb_ref.dtype), emb_ref[...],
                preferred_element_type=jnp.float32)          # (TR, G*E) f32

    # Single full-lane multiply + unmasked store.
    o_ref[...] = (w * x_ref[...].astype(jnp.float32)).astype(o_ref.dtype)


def _pick_row_tile(rows: int, target: int) -> int:
    """Largest row tile <= target that divides `rows` and satisfies the sublane rule."""
    if rows <= target:
        return rows
    t = min(target, rows)
    t -= t % 8
    while t >= 8:
        if rows % t == 0:
            return t
        t -= 8
    return rows


def _block_diag(mat, g):
    """Expanded table: out[q*P + p, q*E:(q+1)*E] = mat[p], zeros elsewhere."""
    if g == 1:
        return mat
    p, e = mat.shape
    out = jnp.zeros((g * p, g * e), mat.dtype)
    for q in range(g):
        out = out.at[q * p:(q + 1) * p, q * e:(q + 1) * e].set(mat)
    return out


def weighted_embedding(x, ids, emb_weight, *, max_rows_per_tile=512):
    """x: (B, E) float, ids: (B,) int, emb_weight: (P, E) float -> (B, E)."""
    B, E = x.shape
    P, E2 = emb_weight.shape
    assert E2 == E

    # Lane-packing factor: pack G consecutive rows into one 128-lane row when possible.
    G = 1
    if E < 128 and 128 % E == 0 and B % (128 // E) == 0:
        G = 128 // E
    R = B // G                                  # packed rows

    ids = jnp.clip(ids.astype(jnp.int32), 0, P - 1).reshape(R, G)
    x_p = x.reshape(R, G * E)
    emb_big = _block_diag(emb_weight, G)        # (G*P, G*E), tiny and VMEM-resident

    TR = _pick_row_tile(R, max_rows_per_tile)
    grid = (R // TR,)

    kernel = functools.partial(weighted_embedding_kernel,
                               groups=G, num_participants=P)

    out_p = pl.pallas_call(
        kernel,
        out_shape=jax.ShapeDtypeStruct((R, G * E), x.dtype),
        grid_spec=pltpu.PrefetchScalarGridSpec(
            num_scalar_prefetch=0,
            grid=grid,
            in_specs=[
                pl.BlockSpec((TR, G), lambda i: (i, 0)),          # ids tile
                pl.BlockSpec((G * P, G * E), lambda i: (0, 0)),   # full (expanded) table
                pl.BlockSpec((TR, G * E), lambda i: (i, 0)),      # x tile (lane-dense)
            ],
            out_specs=pl.BlockSpec((TR, G * E), lambda i: (i, 0)),
        ),
        compiler_params=pltpu.CompilerParams(
            dimension_semantics=("parallel",)),                   # no carried state
    )(ids, emb_big, x_p)

    return out_p.reshape(B, E)


if __name__ == "__main__":
    embed_size = 32
    num_participants = 10
    batch = 16

    key = jax.random.PRNGKey(0)
    k_emb, k_x, k_id = jax.random.split(key, 3)

    # nn.Embedding weight initialized as normal(mean=0.5, std=0.01)
    emb_weight = (0.5 + 0.01 * jax.random.normal(
        k_emb, (num_participants, embed_size))).astype(jnp.float32)

    x = jax.random.normal(k_x, (batch, embed_size), dtype=jnp.float32)
    ids = jax.random.randint(k_id, (batch,), 0, num_participants, dtype=jnp.int32)

    out = weighted_embedding(x, ids, emb_weight)
    out = jax.block_until_ready(out)

    # pure-JAX reference check
    ref = emb_weight[ids] * x
    assert out.shape == (batch, embed_size)
    assert jnp.allclose(out, ref, atol=1e-6, rtol=1e-6)

    print("KERNEL_OK")
</pallas_src>

<mosaic_0001>
module attributes {stable_mosaic.version = 11 : i64} {
  func.func @weighted_embedding_kernel(%arg0: i32, %arg1: memref<4x4xi32, #tpu.memory_space<vmem>>, %arg2: memref<40x128xf32, #tpu.memory_space<vmem>>, %arg3: memref<4x128xf32, #tpu.memory_space<vmem>>, %arg4: memref<4x128xf32, #tpu.memory_space<vmem>>) attributes {dimension_semantics = [#tpu.dimension_semantics<parallel>], iteration_bounds = array<i64: 1>, scalar_prefetch = 0 : i64, scratch_operands = 0 : i64, tpu.core_type = #tpu.core_type<tc>, window_params = [{transform_indices = @transform_0, window_bounds = array<i64: 4, 4>}, {pipeline_mode = #tpu.pipeline_mode<synchronous>, transform_indices = @transform_1, window_bounds = array<i64: 40, 128>}, {transform_indices = @transform_2, window_bounds = array<i64: 4, 128>}, {transform_indices = @transform_3, window_bounds = array<i64: 4, 128>}]} {
    %c0 = arith.constant 0 : index
    %c0_0 = arith.constant 0 : index
    %0 = vector.load %arg1[%c0, %c0_0] : memref<4x4xi32, #tpu.memory_space<vmem>>, vector<4x4xi32>
    %1 = tpu.iota {dimensions = array<i32: 1>} : vector<4x40xi32>
    %2 = vector.extract_strided_slice %0 {offsets = [0, 0], sizes = [4, 1], strides = [1, 1]} : vector<4x4xi32> to vector<4x1xi32>
    %c0_i32 = arith.constant 0 : i32
    %3 = vector.broadcast %c0_i32 : i32 to vector<4x1xi32>
    %4 = arith.addi %2, %3 : vector<4x1xi32>
    %5 = vector.broadcast %4 : vector<4x1xi32> to vector<4x40xi32>
    %6 = arith.cmpi eq, %1, %5 : vector<4x40xi32>
    %7 = vector.extract_strided_slice %0 {offsets = [0, 1], sizes = [4, 1], strides = [1, 1]} : vector<4x4xi32> to vector<4x1xi32>
    %c10_i32 = arith.constant 10 : i32
    %8 = vector.broadcast %c10_i32 : i32 to vector<4x1xi32>
    %9 = arith.addi %7, %8 : vector<4x1xi32>
    %10 = vector.broadcast %9 : vector<4x1xi32> to vector<4x40xi32>
    %11 = arith.cmpi eq, %1, %10 : vector<4x40xi32>
    %12 = arith.ori %6, %11 : vector<4x40xi1>
    %13 = vector.extract_strided_slice %0 {offsets = [0, 2], sizes = [4, 1], strides = [1, 1]} : vector<4x4xi32> to vector<4x1xi32>
    %c20_i32 = arith.constant 20 : i32
    %14 = vector.broadcast %c20_i32 : i32 to vector<4x1xi32>
    %15 = arith.addi %13, %14 : vector<4x1xi32>
    %16 = vector.broadcast %15 : vector<4x1xi32> to vector<4x40xi32>
    %17 = arith.cmpi eq, %1, %16 : vector<4x40xi32>
    %18 = arith.ori %12, %17 : vector<4x40xi1>
    %19 = vector.extract_strided_slice %0 {offsets = [0, 3], sizes = [4, 1], strides = [1, 1]} : vector<4x4xi32> to vector<4x1xi32>
    %c30_i32 = arith.constant 30 : i32
    %20 = vector.broadcast %c30_i32 : i32 to vector<4x1xi32>
    %21 = arith.addi %19, %20 : vector<4x1xi32>
    %22 = vector.broadcast %21 : vector<4x1xi32> to vector<4x40xi32>
    %23 = arith.cmpi eq, %1, %22 : vector<4x40xi32>
    %24 = arith.ori %18, %23 : vector<4x40xi1>
    %25 = arith.extui %24 : vector<4x40xi1> to vector<4x40xi32>
    %26 = arith.sitofp %25 : vector<4x40xi32> to vector<4x40xf32>
    %c0_1 = arith.constant 0 : index
    %c0_2 = arith.constant 0 : index
    %27 = vector.load %arg2[%c0_1, %c0_2] : memref<40x128xf32, #tpu.memory_space<vmem>>, vector<40x128xf32>
    %cst = arith.constant dense<0.000000e+00> : vector<4x128xf32>
    %28 = tpu.matmul %26, %27, %cst {dimension_numbers = #tpu.dot_dimension_numbers<[1], [0], [0], [1], [0, 0, 1, 1], [], []>} : vector<4x40xf32>, vector<40x128xf32>, vector<4x128xf32> -> vector<4x128xf32>
    %c0_3 = arith.constant 0 : index
    %c0_4 = arith.constant 0 : index
    %29 = vector.load %arg3[%c0_3, %c0_4] : memref<4x128xf32, #tpu.memory_space<vmem>>, vector<4x128xf32>
    %30 = arith.mulf %28, %29 : vector<4x128xf32>
    %c0_5 = arith.constant 0 : index
    %c0_6 = arith.constant 0 : index
    %31 = vector.load %arg4[%c0_5, %c0_6] : memref<4x128xf32, #tpu.memory_space<vmem>>, vector<4x128xf32>
    tpu.vector_store %arg4[%c0_5, %c0_6], %30 {strides = array<i32>} : memref<4x128xf32, #tpu.memory_space<vmem>>, vector<4x128xf32>,
    return
  }
  func.func @transform_0(%arg0: i32) -> (i32, i32) {
    %c0_i32 = arith.constant 0 : i32
    %c0_i32_0 = arith.constant 0 : i32
    return %arg0, %c0_i32 : i32, i32
  }
  func.func @transform_1(%arg0: i32) -> (i32, i32) {
    %c0_i32 = arith.constant 0 : i32
    %c0_i32_0 = arith.constant 0 : i32
    %c0_i32_1 = arith.constant 0 : i32
    return %c0_i32, %c0_i32_0 : i32, i32
  }
  func.func @transform_2(%arg0: i32) -> (i32, i32) {
    %c0_i32 = arith.constant 0 : i32
    %c0_i32_0 = arith.constant 0 : i32
    return %arg0, %c0_i32 : i32, i32
  }
  func.func @transform_3(%arg0: i32) -> (i32, i32) {
    %c0_i32 = arith.constant 0 : i32
    %c0_i32_0 = arith.constant 0 : i32
    return %arg0, %c0_i32 : i32, i32
  }
}

</mosaic_0001>

<bundles_post_ra>
// kernel: tpu_custom_call.1
= control target key start
LH: loop header
LB: loop body
LE: loop exit
PB: predicated region body
PF: predicated region fallthrough
CT: control target
= control target key end

     0   :  { %8 = vsyncpa [#allocation3], 0  ;;  %s360_s0 = inlined_call_operand.hbm [shape: s32[4,4], index: 0, kind: input, shape index: {}]   ;;  %s361_s1 = inlined_call_operand.hbm [shape: f32[40,128], index: 1, kind: input, shape index: {}]   ;;  %s362_s2 = inlined_call_operand.vmem [shape: f32[4,128], index: 2, kind: input, shape index: {}]   ;;  %s363_s3 = inlined_call_operand.hbm [shape: f32[4,128], index: 3, kind: output, shape index: {}]  }
   0x1   :  { %9 = vsyncpa [#allocation6], 0 }
   0x2   :  { %10 = vsyncpa [#allocation4], 0  ;;  %s282_s12 = smov [#allocation2]   ;;  %s283_s14 = smov [#allocation5]  }
   0x3   :  { %s17_s13 = sshll.u32 %s282_s12, 4  ;;  %s26_s15 = sshll.u32 %s283_s14, 4  ;;  %s18_s13 = int_to_ptr.vmem [resolvable:$true] %s17_s13  ;;  %s314_s15 = int_to_ptr.vmem [resolvable:$true] %s26_s15 }
   0x4   :  { %s210_s18 = scalar_lea.hbm %s360_s0, 64 }
   0x5   :  { %p211_p0 = scmp.ne.s32.totalorder %s360_s0, %s210_s18  ;;  %p214_p1 = scmp.lt.u32.totalorder %s210_s18, %s360_s0 }
   0x7   :  { %p216_p2 = pnand %p214_p1, %p211_p0 }
   0x9   :  { %219 = shalt.err (!%p216_p2)
}
   0xa   :  { %s220_s23 = scalar_lea.vmem %s18_s13, 64  ;;  %p225_p4 = scmp.lt.s32.totalorder %s18_s13, %s18_s13 }
   0xb   :  { %p221_p3 = scmp.ne.s32.totalorder %s18_s13, %s220_s23  ;;  %p226_p5 = scmp.lt.s32.totalorder %s220_s23, %s220_s23 }
   0xd   :  { %p227_p6 = por %p226_p5, %p225_p4 }
   0xf   :  { %p228_p7 = pnand %p227_p6, %p221_p3 }
  0x11   :  { %231 = shalt.err (!%p228_p7)
}
  0x12   :  { %20 = dma.hbm_to_vmem [thread:$0]  %s360_s0, 64, %s18_s13, [#allocation3]  }
  0x13   :  { %s232_s28 = scalar_lea.hbm %s361_s1, 640 }
  0x14   :  { %p233_p8 = scmp.ne.s32.totalorder %s361_s1, %s232_s28  ;;  %p236_p9 = scmp.lt.u32.totalorder %s232_s28, %s361_s1 }
  0x16   :  { %p238_p10 = pnand %p236_p9, %p233_p8 }
  0x18   :  { %241 = shalt.err (!%p238_p10)
}
  0x19   :  { %s242_s6 = scalar_lea.vmem %s314_s15, 640  ;;  %p247_p12 = scmp.lt.s32.totalorder %s314_s15, %s314_s15 }
  0x1a   :  { %p243_p11 = scmp.ne.s32.totalorder %s314_s15, %s242_s6  ;;  %p248_p13 = scmp.lt.s32.totalorder %s242_s6, %s242_s6 }
  0x1c   :  { %p249_p0 = por %p248_p13, %p247_p12 }
  0x1e   :  { %p250_p1 = pnand %p249_p0, %p243_p11 }
  0x20   :  { %253 = shalt.err (!%p250_p1)
}
  0x21   :  { %s284_s0 = smov 128   ;;  %s285_s7 = smov 8  }
  0x22   :  { %32 = dma.hbm_to_vmem [thread:$0]  %s361_s1, 640, %s314_s15, [#allocation6], %s284_s0, %s284_s0, %s285_s7  }
  0x23   :  { %276 = dma.done.wait [#allocation3], 64  }
  0x24   :  { %277 = vsyncadd [#allocation3], 4294967232 }
  0x25   :  { %278 = dma.done.wait [#allocation6], 640  }
  0x26   :  { %279 = vsyncadd [#allocation6], 4294966656  ;;  %v286_v0 = vmov 0   ;;  %v287_v1 = vmov 2   ;;  %v41_v2 = vld [vmem:[#allocation2] sm:$0xf]  ;;  %v42_v17 = vlaneseq }
  0x27   :  { %205 = vset.pattern.permute.xlu0 %v286_v0  ;;  %207 = vset.pattern.permute.xlu1 %v287_v1  ;;  %v68_v3 = vld [vmem:[#allocation5] sm:$0xff]  ;;  %v69_v4 = vld [vmem:[#allocation5 + $0x8] sm:$0xff]  ;;  %v54_v5 = vadd.s32 20, %v41_v2  ;;  %v288_v6 = vmov 0.0|0.0   ;;  %v48_v8 = vadd.s32 10, %v41_v2  ;;  %v70_v9 = vld [vmem:[#allocation5 + $0x10] sm:$0xff] }
  0x28   :  { %45 = vperm.xlu0 %205, %v41_v2   ;;  %187 = vmatprep.subr.bf16.mxu0 %v288_v6  ;;  %v188_v7 = vpack.c.bf16 %v69_v4, %v68_v3  ;;  %v71_v10 = vld [vmem:[#allocation5 + $0x18] sm:$0xff]  ;;  %v60_v11 = vadd.s32 30, %v41_v2  ;;  %v289_v13 = vmov 1   ;;  %v290_v14 = vmov 3   ;;  %v72_v16 = vld [vmem:[#allocation5 + $0x20] sm:$0xff]  ;;  %s293_s11 = smov [#allocation7]  }
  0x29   :  { %56 = vperm.xlu1 %207, %v54_v5   ;;  %v191_v12 = vpack.c.bf16 %v71_v10, %v70_v9  ;;  %v291_v15 = vmov 0.0   ;;  %vm292_vm0 = vmmov 0   ;;  %v43_v19 = vand.u32 127, %v42_v17  ;;  %v147_v24 = vld [vmem:[%s362_s2] sm:$0xf]  ;;  %s156_s12 = sshll.u32 %s293_s11, 4  ;;  %s157_s12 = int_to_ptr.vmem [resolvable:$true] %s156_s12 }
  0x2a   :  { %189 = vmatpush3.bf16.msra.mxu0 %v188_v7  ;;  %184 = vmatprep.mubr.msk.f32.mxu0 %vm292_vm0, %v291_v15  ;;  %vm73_vm7 = vcmask 326656   ;;  %s254_s13 = scalar_lea.vmem %s157_s12, 64  ;;  %p259_p3 = scmp.lt.s32.totalorder %s157_s12, %s157_s12 }
  0x2b   :  { %190 = vmatprep.subr.bf16.mxu0 %v288_v6  ;;  %p255_p2 = scmp.ne.s32.totalorder %s157_s12, %s254_s13  ;;  %p260_p4 = scmp.lt.s32.totalorder %s254_s13, %s254_s13 }
  0x2c   :  { %206 = vset.pattern.permute.xlu0 %v289_v13 }
  0x2d   :  { %50 = vperm.xlu0 %206, %v48_v8   ;;  %208 = vset.pattern.permute.xlu1 %v290_v14  ;;  %p261_p5 = por %p260_p4, %p259_p3 }
  0x2e   :  { %192 = vmatpush3.bf16.msra.mxu0 %v191_v12  ;;  %62 = vperm.xlu1 %208, %v60_v11  }
  0x2f   :  { %182 = vmatprep.subr.mxu0 %v291_v15  ;;  %p262_p6 = pnand %p261_p5, %p255_p2 }
  0x31   :  { %209 = vset.pattern.permute.xlu0 %v290_v14 }
  0x32   :  { %183 = vmatpush3.msra.mxu0 %v72_v16 }
  0xa7   :  { %v46_v18 = vpop.permute.xlu0 %45 }
  0xa8   :  { %v57_v20 = vpop.permute.xlu1 %56  ;;  %vm47_vm1 = vcmp.eq.s32.totalorder %v43_v19, %v46_v18 }
  0xa9   :  { %vm58_vm3 = vcmp.eq.s32.totalorder %v43_v19, %v57_v20 }
  0xac   :  { %v51_v21 = vpop.permute.xlu0 %50 }
  0xad   :  { %vm52_vm2 = vcmp.eq.s32.totalorder %v43_v19, %v51_v21  ;;  %v63_v22 = vpop.permute.xlu1 %62 }
  0xae   :  { %vm53_vm4 = vmor %vm47_vm1, %vm52_vm2  ;;  %vm64_vm6 = vcmp.eq.s32.totalorder %v43_v19, %v63_v22 }
  0xaf   :  { %vm59_vm5 = vmor %vm53_vm4, %vm58_vm3 }
  0xb0   :  { %vm65_vm8 = vmor %vm59_vm5, %vm64_vm6 }
  0xb1   :  { %v166_v23 = vsel %vm65_vm8, 1.0, %v291_v15 }
  0xb2   :  { %185 = vmatmul.mubr.msk.f32.vlgmr.msra.gmra.mrb[0].mxu0 %vm73_vm7, %v166_v23 }
 0x185   :  { %v143_v25 = vpop.f32.mrb[0].mxu0 }
 0x186   :  { %v148_v26 = vmul.f32 %v147_v24, %v143_v25  ;;  %v186_v27 = vpop.f32.mrb[1].mxu0 }
 0x188   :  { %149 = vst [vmem:[#allocation7] sm:$0xf] %v148_v26 }
 0x189   :  { %265 = shalt.err (!%p262_p6)
}
 0x18a   :  { %s266_s16 = scalar_lea.hbm %s363_s3, 64 }
 0x18b   :  { %p267_p7 = scmp.ne.s32.totalorder %s363_s3, %s266_s16  ;;  %p270_p8 = scmp.lt.u32.totalorder %s266_s16, %s363_s3 }
 0x18d   :  { %p272_p9 = pnand %p270_p8, %p267_p7 }
 0x18f   :  { %275 = shalt.err (!%p272_p9)
}
 0x190   :  { %159 = dma.vmem_to_hbm [thread:$0]  %s157_s12, 64, %s363_s3, [#allocation4]  }
 0x191   :  { %280 = dma.done.wait [#allocation4], 64  }
 0x192   :  { %281 = vsyncadd [#allocation4], 4294967232 }
 0x193   :  { %163 = vsyncpa [#allocation3], 1 }
 0x194   :  { %164 = vsyncpa [#allocation6], 1 }
 0x195   :  { %165 = vsyncpa [#allocation4], 1 }

</bundles_post_ra>
